<compile_context>
chip_gen: v7x
topology: tpu7x:2x2x1
jax: 0.10.0
libtpu: 0.0.40
codegen_flags: <defaults>
</compile_context>

<pallas_src>
import functools

import jax
import jax.numpy as jnp
from jax.experimental import pallas as pl
from jax.experimental.pallas import tpu as pltpu


def _round_up(n, m):
    return ((n + m - 1) // m) * m


# ---------------------------------------------------------------------------
# Fused attention kernel: `bt` batch elements per grid step.
#   x_ref    : (bt, C, HWp)       bf16 (or f32) activations, HW on lanes
#   w_ref    : (rows, C)          stacked 1x1-conv weights (ch_wz folded into ch_wv)
#   slab_ref : (slab_rows, 1) f32 stacked biases | ln_w | ln_b | alpha
#   o_ref    : (bt, C, HWp)       output (caller dtype)
# ---------------------------------------------------------------------------
def _mdca_attn_kernel(x_ref, w_ref, slab_ref, o_ref, *, bt, C, hw, hw_pad, rows,
                      o_cwq, o_swv, o_swq, o_lnw, o_lnb, o_alpha):
    ch = C // 2
    W = w_ref[...]                                   # (rows, C)
    slab = slab_ref[...]                             # (slab_rows, 1) f32
    bias = slab[0:rows]                              # (rows, 1)
    ln_w = slab[o_lnw:o_lnw + C]                     # (C, 1)
    ln_b = slab[o_lnb:o_lnb + C]                     # (C, 1)
    alpha = slab[o_alpha:o_alpha + 1]                # (1, 1)  PReLU slope

    padded = hw_pad != hw
    if padded:
        lane = jax.lax.broadcasted_iota(jnp.int32, (1, hw_pad), 1)
        valid = lane < hw

    inv_hw = 1.0 / hw
    inv_c = 1.0 / C

    # Static (compile-time) unrolled loop over the batch tile.
    for i in range(bt):
        xb = x_ref[i]                                # (C, HWp) bf16/f32
        # One stacked MXU matmul replaces the four tiny 1x1-conv matmuls.
        y = jnp.dot(W, xb, preferred_element_type=jnp.float32) + bias
        x = xb.astype(jnp.float32)                   # elementwise tail in f32

        # ---- channel branch ------------------------------------------------
        cwq = y[o_cwq:o_cwq + 1]                     # (1, HWp)  ch_wq(x)
        if padded:
            cwq = jnp.where(valid, cwq, -1e30)
        cwq = cwq - jnp.max(cwq, axis=-1, keepdims=True)
        e = jnp.exp(cwq)
        q = e * pl.reciprocal(jnp.sum(e, axis=-1, keepdims=True), approx=True)

        # fz == (ch_wz o ch_wv)(x); softmax weights sum to 1, so folding the
        # biases through the composition is exact.
        fz = y[0:C]                                  # (C, HWp)
        z = jnp.sum(fz * q, axis=-1, keepdims=True)  # (C, 1)
        mu = jnp.sum(z, axis=0, keepdims=True) * inv_c
        zc = z - mu
        var = jnp.sum(zc * zc, axis=0, keepdims=True) * inv_c
        zn = zc * jax.lax.rsqrt(var + 1e-5) * ln_w + ln_b
        cw = jax.nn.sigmoid(zn)                      # (C, 1) channel weight

        # ---- spatial branch --------------------------------------------------
        swq = y[o_swq:o_swq + ch]                    # (C/2, HWp) sp_wq(x)
        if padded:
            swq = jnp.where(valid, swq, 0.0)
        sq = jnp.sum(swq, axis=-1, keepdims=True) * inv_hw     # AdaptiveAvgPool2d
        sq = sq - jnp.max(sq, axis=0, keepdims=True)
        e2 = jnp.exp(sq)
        sq = e2 * pl.reciprocal(jnp.sum(e2, axis=0, keepdims=True), approx=True)
        swv = y[o_swv:o_swv + ch]                    # (C/2, HWp) sp_wv(x)
        spz = jnp.sum(sq * swv, axis=0, keepdims=True)          # (1, HWp)
        sw = jax.nn.sigmoid(spz)                     # (1, HWp) spatial weight

        # ---- interrelation ---------------------------------------------------
        channel_out = cw * x                         # (C, HWp)
        spatial_out = sw * x                         # (C, HWp)
        out = x * (cw + sw)                          # == channel_out + spatial_out
        pc = jnp.where(channel_out >= 0, channel_out, alpha * channel_out)
        ps = jnp.where(spatial_out >= 0, spatial_out, alpha * spatial_out)
        inter = out * (pc + ps)
        o_ref[i] = (x * jax.nn.sigmoid(inter)).astype(o_ref.dtype)


# ---------------------------------------------------------------------------
# One-time parameter packing (hoisted out of the forward path).
# ---------------------------------------------------------------------------
def pack_params(p, compute_dtype=jnp.bfloat16):
    c = p["ch_wz_w"].shape[0]
    ch = c // 2

    # Fold ch_wz o ch_wv into one (C, C) linear map (exact composition of 1x1 convs).
    fused_w = p["ch_wz_w"] @ p["ch_wv_w"]                     # (C, C)
    fused_b = p["ch_wz_w"] @ p["ch_wv_b"] + p["ch_wz_b"]      # (C, 1)

    # Stacked weight layout: every group starts on an 8-row (sublane) boundary.
    o_cwq = _round_up(c, 8)
    o_swv = o_cwq + 8
    o_swq = o_swv + _round_up(ch, 8)
    rows = o_swq + _round_up(ch, 8)

    def pad_rows(a, total):
        pad = total - a.shape[0]
        if pad == 0:
            return a
        return jnp.concatenate([a, jnp.zeros((pad,) + a.shape[1:], a.dtype)], 0)

    stacked_w = jnp.concatenate([
        pad_rows(fused_w, o_cwq),
        pad_rows(p["ch_wq_w"], o_swv - o_cwq),
        pad_rows(p["sp_wv_w"], o_swq - o_swv),
        pad_rows(p["sp_wq_w"], rows - o_swq),
    ], axis=0).astype(compute_dtype)                          # (rows, C)

    stacked_b = jnp.concatenate([
        pad_rows(fused_b, o_cwq),
        pad_rows(p["ch_wq_b"], o_swv - o_cwq),
        pad_rows(p["sp_wv_b"], o_swq - o_swv),
        pad_rows(p["sp_wq_b"], rows - o_swq),
    ], axis=0).astype(jnp.float32)                            # (rows, 1)

    # One f32 slab: [biases | ln_w | ln_b | alpha], each segment 8-row aligned.
    cp = _round_up(c, 8)
    slab = jnp.concatenate([
        stacked_b,
        pad_rows(p["ln_w"].reshape(c, 1).astype(jnp.float32), cp),
        pad_rows(p["ln_b"].reshape(c, 1).astype(jnp.float32), cp),
        pad_rows(p["alpha"].reshape(1, 1).astype(jnp.float32), 8),
    ], axis=0)                                                # (rows + 2*cp + 8, 1)

    return {"w": stacked_w, "slab": slab}


def _pick_batch_tile(b, c, hw_pad, in_bytes, out_bytes,
                     max_bt=16, vmem_budget=12 * 1024 * 1024):
    """Batch elements per grid step: amortize per-step overhead, keep >=2 grid
    steps when B>=2 (v7x megacore), fit comfortably in VMEM, divide B."""
    per = c * hw_pad * (in_bytes + out_bytes) * 2     # double-buffered in+out
    cap = max(1, vmem_budget // per)
    target = max(1, b // 2) if b >= 2 else 1          # keep grid length >= 2
    bt = int(min(target, cap, max_bt, b))
    while b % bt != 0:
        bt -= 1
    return bt


# ---------------------------------------------------------------------------
# Forward wrapper: just the pallas_call (weights already packed).
# ---------------------------------------------------------------------------
def mdca_attention_forward(x, packed):
    """x: (B, C, H, W). packed: output of pack_params. Returns same shape/dtype."""
    b, c, h, w = x.shape
    hw = h * w
    hw_pad = _round_up(hw, 128)                       # lane-dense, unmasked stores
    ch = c // 2

    stacked_w = packed["w"]
    slab = packed["slab"]
    rows = stacked_w.shape[0]

    o_cwq = _round_up(c, 8)
    o_swv = o_cwq + 8
    o_swq = o_swv + _round_up(ch, 8)
    cp = _round_up(c, 8)
    o_lnw = rows
    o_lnb = o_lnw + cp
    o_alpha = o_lnb + cp

    xf = x.reshape(b, c, hw).astype(stacked_w.dtype)  # bf16 in HBM -> half the DMA bytes
    if hw_pad != hw:
        xf = jnp.pad(xf, ((0, 0), (0, 0), (0, hw_pad - hw)))

    bt = _pick_batch_tile(b, c, hw_pad,
                          in_bytes=jnp.dtype(xf.dtype).itemsize,
                          out_bytes=jnp.dtype(x.dtype).itemsize)

    kernel = functools.partial(
        _mdca_attn_kernel, bt=bt, C=c, hw=hw, hw_pad=hw_pad, rows=rows,
        o_cwq=o_cwq, o_swv=o_swv, o_swq=o_swq,
        o_lnw=o_lnw, o_lnb=o_lnb, o_alpha=o_alpha)

    cost = pl.CostEstimate(
        flops=int(b * (2 * rows * c * hw_pad + 24 * c * hw_pad)),
        transcendentals=int(b * (3 * c * hw_pad + 2 * hw_pad + 2 * c)),
        bytes_accessed=int(b * c * hw_pad
                           * (jnp.dtype(xf.dtype).itemsize + jnp.dtype(x.dtype).itemsize)
                           + stacked_w.size * jnp.dtype(stacked_w.dtype).itemsize
                           + slab.size * 4))

    out = pl.pallas_call(
        kernel,
        out_shape=jax.ShapeDtypeStruct((b, c, hw_pad), x.dtype),
        grid_spec=pltpu.PrefetchScalarGridSpec(
            num_scalar_prefetch=0,
            grid=(b // bt,),
            in_specs=[
                pl.BlockSpec((bt, c, hw_pad), lambda i: (i, 0, 0)),   # activations
                pl.BlockSpec((rows, c), lambda i: (0, 0)),            # stacked weights
                pl.BlockSpec((slab.shape[0], 1), lambda i: (0, 0)),   # bias/ln/alpha slab
            ],
            out_specs=pl.BlockSpec((bt, c, hw_pad), lambda i: (i, 0, 0)),
        ),
        compiler_params=pltpu.CompilerParams(
            dimension_semantics=("parallel",),       # batch steps sharded across TCs on v7x
            vmem_limit_bytes=32 * 1024 * 1024,
        ),
        cost_estimate=cost,
    )(xf, stacked_w, slab)

    if hw_pad != hw:
        out = out[:, :, :hw]
    return out.reshape(b, c, h, w)


# ---------------------------------------------------------------------------
# Pure-JAX reference (mirrors the PyTorch forward) for in-script validation.
# ---------------------------------------------------------------------------
def mdca_attention_reference(x, p):
    b, c, h, w = x.shape
    hw = h * w
    xf = x.reshape(b, c, hw)

    cwv = jnp.einsum("kc,bcs->bks", p["ch_wv_w"], xf) + p["ch_wv_b"][None]
    cwq = jnp.einsum("kc,bcs->bks", p["ch_wq_w"], xf) + p["ch_wq_b"][None]
    cwq = jax.nn.softmax(cwq, axis=-1)                              # softmax over HW
    chz = jnp.einsum("bks,bos->bko", cwv, cwq)                      # (b, c/2, 1)
    z = jnp.einsum("ck,bko->bco", p["ch_wz_w"], chz) + p["ch_wz_b"][None]
    mu = jnp.mean(z, axis=1, keepdims=True)
    var = jnp.mean((z - mu) ** 2, axis=1, keepdims=True)
    zn = (z - mu) / jnp.sqrt(var + 1e-5)
    zn = zn * p["ln_w"].reshape(1, c, 1) + p["ln_b"].reshape(1, c, 1)
    channel_out = jax.nn.sigmoid(zn) * xf

    swv = jnp.einsum("kc,bcs->bks", p["sp_wv_w"], xf) + p["sp_wv_b"][None]
    swq = jnp.einsum("kc,bcs->bks", p["sp_wq_w"], xf) + p["sp_wq_b"][None]
    swq = jnp.mean(swq, axis=-1, keepdims=True)                     # avg pool
    swq = jax.nn.softmax(swq, axis=1)                               # softmax over c/2
    spz = jnp.sum(swq * swv, axis=1, keepdims=True)                 # (b, 1, hw)
    spatial_out = jax.nn.sigmoid(spz) * xf

    out = channel_out + spatial_out
    alpha = p["alpha"][0]
    prelu = lambda v: jnp.where(v >= 0, v, alpha * v)
    inter = out * prelu(channel_out) + out * prelu(spatial_out)
    return (xf * jax.nn.sigmoid(inter)).reshape(b, c, h, w)


def init_params(key, c):
    ks = jax.random.split(key, 10)
    u = lambda k, shape: jax.random.uniform(k, shape, jnp.float32, -0.1, 0.1)
    return dict(
        ch_wv_w=u(ks[0], (c // 2, c)), ch_wv_b=u(ks[1], (c // 2, 1)),
        ch_wq_w=u(ks[2], (1, c)),      ch_wq_b=u(ks[3], (1, 1)),
        ch_wz_w=u(ks[4], (c, c // 2)), ch_wz_b=u(ks[5], (c, 1)),
        ln_w=jnp.ones((c,), jnp.float32), ln_b=jnp.zeros((c,), jnp.float32),
        sp_wv_w=u(ks[6], (c // 2, c)), sp_wv_b=u(ks[7], (c // 2, 1)),
        sp_wq_w=u(ks[8], (c // 2, c)), sp_wq_b=u(ks[9], (c // 2, 1)),
        alpha=jnp.full((1,), 0.25, jnp.float32),    # nn.PReLU default (1 shared slope)
    )


if __name__ == "__main__":
    # channel=32 (module default); H*W = 128 gives a full, dense lane tile.
    batch, channels, height, width = 2, 32, 8, 16

    root = jax.random.PRNGKey(0)
    kx, kp = jax.random.split(root)
    x = jax.random.normal(kx, (batch, channels, height, width), jnp.float32)
    params = init_params(kp, channels)
    y_ref = mdca_attention_reference(x, params)

    fwd = jax.jit(mdca_attention_forward)

    # Strict correctness check with f32 in-kernel data path.
    packed_f32 = pack_params(params, compute_dtype=jnp.float32)
    y32 = fwd(x, packed_f32)
    jax.block_until_ready(y32)
    assert y32.shape == x.shape and y32.dtype == x.dtype
    err32 = float(jnp.max(jnp.abs(y32 - y_ref)))
    assert err32 < 3e-2, f"f32 path mismatch vs reference: max abs err {err32}"

    # Production path: bf16 activations/weights in HBM (halved DMA bytes).
    packed_bf16 = pack_params(params, compute_dtype=jnp.bfloat16)
    y16 = fwd(x, packed_bf16)
    jax.block_until_ready(y16)
    assert y16.shape == x.shape and y16.dtype == x.dtype
    err16 = float(jnp.max(jnp.abs(y16 - y_ref)))
    assert err16 < 1e-1, f"bf16 path mismatch vs reference: max abs err {err16}"

    print("KERNEL_OK")
</pallas_src>

<mosaic_0001>
module attributes {stable_mosaic.version = 11 : i64} {
  func.func @_mdca_attn_kernel(%arg0: i32, %arg1: memref<1x32x128xf32, #tpu.memory_space<vmem>>, %arg2: memref<72x32xf32, #tpu.memory_space<vmem>>, %arg3: memref<144x1xf32, #tpu.memory_space<vmem>>, %arg4: memref<1x32x128xf32, #tpu.memory_space<vmem>>) attributes {dimension_semantics = [#tpu.dimension_semantics<parallel>], iteration_bounds = array<i64: 2>, scalar_prefetch = 0 : i64, scratch_operands = 0 : i64, tpu.core_type = #tpu.core_type<tc>, window_params = [{transform_indices = @transform_0, window_bounds = array<i64: 1, 32, 128>}, {pipeline_mode = #tpu.pipeline_mode<synchronous>, transform_indices = @transform_1, window_bounds = array<i64: 72, 32>}, {pipeline_mode = #tpu.pipeline_mode<synchronous>, transform_indices = @transform_2, window_bounds = array<i64: 144, 1>}, {transform_indices = @transform_3, window_bounds = array<i64: 1, 32, 128>}]} {
    %c0 = arith.constant 0 : index
    %c0_0 = arith.constant 0 : index
    %0 = vector.load %arg2[%c0, %c0_0] : memref<72x32xf32, #tpu.memory_space<vmem>>, vector<72x32xf32>
    %c0_1 = arith.constant 0 : index
    %c0_2 = arith.constant 0 : index
    %1 = vector.load %arg3[%c0_1, %c0_2] : memref<144x1xf32, #tpu.memory_space<vmem>>, vector<144x1xf32>
    %2 = vector.extract_strided_slice %1 {offsets = [0, 0], sizes = [72, 1], strides = [1, 1]} : vector<144x1xf32> to vector<72x1xf32>
    %3 = vector.extract_strided_slice %1 {offsets = [72, 0], sizes = [32, 1], strides = [1, 1]} : vector<144x1xf32> to vector<32x1xf32>
    %4 = vector.extract_strided_slice %1 {offsets = [104, 0], sizes = [32, 1], strides = [1, 1]} : vector<144x1xf32> to vector<32x1xf32>
    %5 = vector.extract_strided_slice %1 {offsets = [136, 0], sizes = [1, 1], strides = [1, 1]} : vector<144x1xf32> to vector<1x1xf32>
    %c0_3 = arith.constant 0 : index
    %c0_4 = arith.constant 0 : index
    %c0_5 = arith.constant 0 : index
    %6 = vector.load %arg1[%c0_3, %c0_4, %c0_5] : memref<1x32x128xf32, #tpu.memory_space<vmem>>, vector<1x32x128xf32>
    %7 = vector.shape_cast %6 : vector<1x32x128xf32> to vector<32x128xf32>
    %cst = arith.constant dense<0.000000e+00> : vector<72x128xf32>
    %8 = tpu.matmul %0, %7, %cst {dimension_numbers = #tpu.dot_dimension_numbers<[1], [0], [0], [1], [0, 0, 1, 1], [], []>} : vector<72x32xf32>, vector<32x128xf32>, vector<72x128xf32> -> vector<72x128xf32>
    %9 = vector.broadcast %2 : vector<72x1xf32> to vector<72x128xf32>
    %10 = arith.addf %8, %9 : vector<72x128xf32>
    %11 = vector.extract_strided_slice %10 {offsets = [32, 0], sizes = [1, 128], strides = [1, 1]} : vector<72x128xf32> to vector<1x128xf32>
    %cst_6 = arith.constant dense<0xFF800000> : vector<1xf32>
    %12 = vector.multi_reduction <maximumf>, %11, %cst_6 [1] : vector<1x128xf32> to vector<1xf32>
    %13 = vector.shape_cast %12 : vector<1xf32> to vector<1x1xf32>
    %14 = vector.broadcast %13 : vector<1x1xf32> to vector<1x128xf32>
    %15 = arith.subf %11, %14 : vector<1x128xf32>
    %16 = math.exp %15 : vector<1x128xf32>
    %cst_7 = arith.constant dense<0.000000e+00> : vector<1xf32>
    %17 = vector.multi_reduction <add>, %16, %cst_7 [1] : vector<1x128xf32> to vector<1xf32>
    %18 = vector.shape_cast %17 : vector<1xf32> to vector<1x1xf32>
    %19 = tpu.reciprocal %18 {approx = true} : vector<1x1xf32> -> vector<1x1xf32>
    %20 = vector.broadcast %19 : vector<1x1xf32> to vector<1x128xf32>
    %21 = arith.mulf %16, %20 : vector<1x128xf32>
    %22 = vector.extract_strided_slice %10 {offsets = [0, 0], sizes = [32, 128], strides = [1, 1]} : vector<72x128xf32> to vector<32x128xf32>
    %23 = vector.broadcast %21 : vector<1x128xf32> to vector<32x128xf32>
    %24 = arith.mulf %22, %23 : vector<32x128xf32>
    %cst_8 = arith.constant dense<0.000000e+00> : vector<32xf32>
    %25 = vector.multi_reduction <add>, %24, %cst_8 [1] : vector<32x128xf32> to vector<32xf32>
    %26 = vector.shape_cast %25 : vector<32xf32> to vector<32x1xf32>
    %cst_9 = arith.constant dense<0.000000e+00> : vector<1xf32>
    %27 = vector.multi_reduction <add>, %26, %cst_9 [0] : vector<32x1xf32> to vector<1xf32>
    %28 = vector.shape_cast %27 : vector<1xf32> to vector<1x1xf32>
    %cst_10 = arith.constant 3.125000e-02 : f32
    %29 = vector.broadcast %cst_10 : f32 to vector<1x1xf32>
    %30 = arith.mulf %28, %29 : vector<1x1xf32>
    %31 = vector.broadcast %30 : vector<1x1xf32> to vector<32x1xf32>
    %32 = arith.subf %26, %31 : vector<32x1xf32>
    %33 = arith.mulf %32, %32 : vector<32x1xf32>
    %cst_11 = arith.constant dense<0.000000e+00> : vector<1xf32>
    %34 = vector.multi_reduction <add>, %33, %cst_11 [0] : vector<32x1xf32> to vector<1xf32>
    %35 = vector.shape_cast %34 : vector<1xf32> to vector<1x1xf32>
    %cst_12 = arith.constant 3.125000e-02 : f32
    %36 = vector.broadcast %cst_12 : f32 to vector<1x1xf32>
    %37 = arith.mulf %35, %36 : vector<1x1xf32>
    %cst_13 = arith.constant 9.99999974E-6 : f32
    %38 = vector.broadcast %cst_13 : f32 to vector<1x1xf32>
    %39 = arith.addf %37, %38 : vector<1x1xf32>
    %40 = math.rsqrt %39 : vector<1x1xf32>
    %41 = vector.broadcast %40 : vector<1x1xf32> to vector<32x1xf32>
    %42 = arith.mulf %32, %41 : vector<32x1xf32>
    %43 = arith.mulf %42, %3 : vector<32x1xf32>
    %44 = arith.addf %43, %4 : vector<32x1xf32>
    %45 = arith.negf %44 : vector<32x1xf32>
    %46 = math.exp %45 : vector<32x1xf32>
    %cst_14 = arith.constant 1.000000e+00 : f32
    %47 = vector.broadcast %cst_14 : f32 to vector<32x1xf32>
    %48 = arith.addf %47, %46 : vector<32x1xf32>
    %49 = arith.divf %47, %48 : vector<32x1xf32>
    %50 = vector.extract_strided_slice %10 {offsets = [56, 0], sizes = [16, 128], strides = [1, 1]} : vector<72x128xf32> to vector<16x128xf32>
    %cst_15 = arith.constant dense<0.000000e+00> : vector<16xf32>
    %51 = vector.multi_reduction <add>, %50, %cst_15 [1] : vector<16x128xf32> to vector<16xf32>
    %52 = vector.shape_cast %51 : vector<16xf32> to vector<16x1xf32>
    %cst_16 = arith.constant 7.812500e-03 : f32
    %53 = vector.broadcast %cst_16 : f32 to vector<16x1xf32>
    %54 = arith.mulf %52, %53 : vector<16x1xf32>
    %cst_17 = arith.constant dense<0xFF800000> : vector<1xf32>
    %55 = vector.multi_reduction <maximumf>, %54, %cst_17 [0] : vector<16x1xf32> to vector<1xf32>
    %56 = vector.shape_cast %55 : vector<1xf32> to vector<1x1xf32>
    %57 = vector.broadcast %56 : vector<1x1xf32> to vector<16x1xf32>
    %58 = arith.subf %54, %57 : vector<16x1xf32>
    %59 = math.exp %58 : vector<16x1xf32>
    %cst_18 = arith.constant dense<0.000000e+00> : vector<1xf32>
    %60 = vector.multi_reduction <add>, %59, %cst_18 [0] : vector<16x1xf32> to vector<1xf32>
    %61 = vector.shape_cast %60 : vector<1xf32> to vector<1x1xf32>
    %62 = tpu.reciprocal %61 {approx = true} : vector<1x1xf32> -> vector<1x1xf32>
    %63 = vector.broadcast %62 : vector<1x1xf32> to vector<16x1xf32>
    %64 = arith.mulf %59, %63 : vector<16x1xf32>
    %65 = vector.extract_strided_slice %10 {offsets = [40, 0], sizes = [16, 128], strides = [1, 1]} : vector<72x128xf32> to vector<16x128xf32>
    %66 = vector.broadcast %64 : vector<16x1xf32> to vector<16x128xf32>
    %67 = arith.mulf %66, %65 : vector<16x128xf32>
    %cst_19 = arith.constant dense<0.000000e+00> : vector<128xf32>
    %68 = vector.multi_reduction <add>, %67, %cst_19 [0] : vector<16x128xf32> to vector<128xf32>
    %69 = vector.shape_cast %68 : vector<128xf32> to vector<1x128xf32>
    %70 = arith.negf %69 : vector<1x128xf32>
    %71 = math.exp %70 : vector<1x128xf32>
    %cst_20 = arith.constant 1.000000e+00 : f32
    %72 = vector.broadcast %cst_20 : f32 to vector<1x128xf32>
    %73 = arith.addf %72, %71 : vector<1x128xf32>
    %74 = arith.divf %72, %73 : vector<1x128xf32>
    %75 = vector.broadcast %49 : vector<32x1xf32> to vector<32x128xf32>
    %76 = arith.mulf %75, %7 : vector<32x128xf32>
    %77 = vector.broadcast %74 : vector<1x128xf32> to vector<32x128xf32>
    %78 = arith.mulf %77, %7 : vector<32x128xf32>
    %79 = vector.broadcast %49 : vector<32x1xf32> to vector<32x128xf32>
    %80 = vector.broadcast %74 : vector<1x128xf32> to vector<32x128xf32>
    %81 = arith.addf %79, %80 : vector<32x128xf32>
    %82 = arith.mulf %7, %81 : vector<32x128xf32>
    %cst_21 = arith.constant 0.000000e+00 : f32
    %83 = vector.broadcast %cst_21 : f32 to vector<32x128xf32>
    %84 = arith.cmpf oge, %76, %83 : vector<32x128xf32>
    %85 = vector.broadcast %5 : vector<1x1xf32> to vector<32x128xf32>
    %86 = arith.mulf %85, %76 : vector<32x128xf32>
    %87 = arith.select %84, %76, %86 : vector<32x128xi1>, vector<32x128xf32>
    %cst_22 = arith.constant 0.000000e+00 : f32
    %88 = vector.broadcast %cst_22 : f32 to vector<32x128xf32>
    %89 = arith.cmpf oge, %78, %88 : vector<32x128xf32>
    %90 = vector.broadcast %5 : vector<1x1xf32> to vector<32x128xf32>
    %91 = arith.mulf %90, %78 : vector<32x128xf32>
    %92 = arith.select %89, %78, %91 : vector<32x128xi1>, vector<32x128xf32>
    %93 = arith.addf %87, %92 : vector<32x128xf32>
    %94 = arith.mulf %82, %93 : vector<32x128xf32>
    %95 = arith.negf %94 : vector<32x128xf32>
    %96 = math.exp %95 : vector<32x128xf32>
    %cst_23 = arith.constant 1.000000e+00 : f32
    %97 = vector.broadcast %cst_23 : f32 to vector<32x128xf32>
    %98 = arith.addf %97, %96 : vector<32x128xf32>
    %99 = arith.divf %97, %98 : vector<32x128xf32>
    %100 = arith.mulf %7, %99 : vector<32x128xf32>
    %c0_24 = arith.constant 0 : index
    %c0_25 = arith.constant 0 : index
    %c0_26 = arith.constant 0 : index
    %101 = vector.load %arg4[%c0_24, %c0_25, %c0_26] : memref<1x32x128xf32, #tpu.memory_space<vmem>>, vector<1x32x128xf32>
    %102 = vector.shape_cast %101 : vector<1x32x128xf32> to vector<32x128xf32>
    %103 = vector.shape_cast %100 : vector<32x128xf32> to vector<1x32x128xf32>
    tpu.vector_store %arg4[%c0_24, %c0_25, %c0_26], %103 {strides = array<i32>} : memref<1x32x128xf32, #tpu.memory_space<vmem>>, vector<1x32x128xf32>,
    return
  }
  func.func @transform_0(%arg0: i32) -> (i32, i32, i32) {
    %c0_i32 = arith.constant 0 : i32
    %c0_i32_0 = arith.constant 0 : i32
    %c0_i32_1 = arith.constant 0 : i32
    return %arg0, %c0_i32, %c0_i32_0 : i32, i32, i32
  }
  func.func @transform_1(%arg0: i32) -> (i32, i32) {
    %c0_i32 = arith.constant 0 : i32
    %c0_i32_0 = arith.constant 0 : i32
    %c0_i32_1 = arith.constant 0 : i32
    return %c0_i32, %c0_i32_0 : i32, i32
  }
  func.func @transform_2(%arg0: i32) -> (i32, i32) {
    %c0_i32 = arith.constant 0 : i32
    %c0_i32_0 = arith.constant 0 : i32
    %c0_i32_1 = arith.constant 0 : i32
    return %c0_i32, %c0_i32_0 : i32, i32
  }
  func.func @transform_3(%arg0: i32) -> (i32, i32, i32) {
    %c0_i32 = arith.constant 0 : i32
    %c0_i32_0 = arith.constant 0 : i32
    %c0_i32_1 = arith.constant 0 : i32
    return %arg0, %c0_i32, %c0_i32_0 : i32, i32, i32
  }
}

</mosaic_0001>

<bundles_post_ra>
// kernel: mdca_attention_forward.1
= control target key start
LH: loop header
LB: loop body
LE: loop exit
PB: predicated region body
PF: predicated region fallthrough
CT: control target
= control target key end

     0   :  { %s867_s12 = smov 0   ;;  %s1028_s0 = inlined_call_operand.vmem [shape: f32[2,32,128], index: 0, kind: input, shape index: {}]   ;;  %s1029_s1 = inlined_call_operand.vmem [shape: f32[72,32], index: 1, kind: input, shape index: {}]   ;;  %s1030_s2 = inlined_call_operand.vmem [shape: f32[144,1], index: 2, kind: input, shape index: {}]   ;;  %s1031_s3 = inlined_call_operand.vmem [shape: f32[2,32,128], index: 3, kind: output, shape index: {}]  }
   0x1 LB: > { %s682_s13 = sadd.s32 4294967295, %s841_s12   ;;  %p686_p0 = scmp.ge.s32.totalorder %s841_s12, 1  ;;  %s841_s12 = sphi %s867_s12, %s13_s12  }
   0x2   : > { %p137_p1 = scmp.lt.s32.totalorder %s841_s12, 3 }
   0x4   : > { %p138_p2 = pnand %p686_p0, %p137_p1 }
   0x5   : > { %p161_p3 = scmp.lt.s32.totalorder (!%p138_p2), %s682_s13, 1  ;;  %v843_v0 = vmov (!%p138_p2), 0.0|0.0   ;;  %vm844_vm0 = vmmov (!%p138_p2), 0   ;;  %v845_v1 = vmov (!%p138_p2), 0.0   ;;  %v846_v2 = vmov (!%p138_p2), 0   ;;  %v180_v3 = vld [vmem:[%s1030_s2] sm:$0xff] (!%p138_p2) }
   0x6   : > { %141 = sbr.rel (%p138_p2) target bundleno = 980 (0x3d4), region = 32  ;;  %761 = vmatprep.subr.bf16.mxu0 (!%p138_p2), %v843_v0  ;;  %734 = vmatprep.mubr.msk.f32.mxu0 (!%p138_p2), %vm844_vm0, %v845_v1  ;;  %v184_v4 = vld [vmem:[%s1030_s2 + $0x20] sm:$0xff] (!%p138_p2)  ;;  %v181_v5 = vld [vmem:[%s1030_s2 + $0x8] sm:$0xff] (!%p138_p2)  ;;  %v182_v11 = vld [vmem:[%s1030_s2 + $0x10] sm:$0xff] (!%p138_p2)  ;;  %vm247_vm1 = vcmask (!%p138_p2), 261120   ;;  %vm385_vm2 = vcmask (!%p138_p2), 1040384   ;;  %v397_v55 = vlaneseq (!%p138_p2) }
   0x7   : > { %786 = vset.pattern.permute.xlu1 (!%p138_p2), %v846_v2  ;;  %785 = vset.pattern.permute.xlu0 (!%p138_p2), %v846_v2  ;;  %v171_v13 = vld [vmem:[%s1029_s1] sm:$0xff] (!%p138_p2)  ;;  %v176_v14 = vld [vmem:[%s1029_s1 + $0x28] sm:$0xff] (!%p138_p2)  ;;  %v177_v16 = vld [vmem:[%s1029_s1 + $0x30] sm:$0xff] (!%p138_p2) }
   0x8   : > { %204 = vperm.xlu1 (!%p138_p2), %786, %v180_v3   ;;  %767 = vmatprep.subr.bf16.mxu1 (!%p138_p2), %v843_v0  ;;  %v172_v15 = vld [vmem:[%s1029_s1 + $0x8] sm:$0xff] (!%p138_p2)  ;;  %v173_v17 = vld [vmem:[%s1029_s1 + $0x10] sm:$0xff] (!%p138_p2)  ;;  %v178_v18 = vld [vmem:[%s1029_s1 + $0x38] sm:$0xff] (!%p138_p2)  ;;  %v398_v56 = vshrl.u32 (!%p138_p2), %v397_v55, 7 }
   0x9   : > { %224 = vperm.xlu0 (!%p138_p2), %785, %v184_v4   ;;  %749 = vmatprep.mubr.msk.f32.mxu1 (!%p138_p2), %vm844_vm0, %v845_v1  ;;  %v174_v19 = vld [vmem:[%s1029_s1 + $0x18] sm:$0xff] (!%p138_p2)  ;;  %v179_v20 = vld [vmem:[%s1029_s1 + $0x40] sm:$0xff] (!%p138_p2) }
   0xa   : > { %v175_v21 = vld [vmem:[%s1029_s1 + $0x20] sm:$0xff] (!%p138_p2)  ;;  %v183_v49 = vld [vmem:[%s1030_s2 + $0x18] sm:$0xff] (!%p138_p2)  ;;  %v399_v57 = vsub.s32 (!%p138_p2), 0, %v398_v56 }
   0xb   : > { %v188_v39 = vld [vmem:[%s1030_s2 + $0x40] sm:$0xff] (!%p138_p2)  ;;  %v187_v50 = vld [vmem:[%s1030_s2 + $0x38] sm:$0xff] (!%p138_p2) }
   0xc   : > { %209 = vperm.xlu1 (!%p138_p2), %786, %v181_v5  }
   0xd   : > { %s1033_s13 = smov (!%p161_p3, %s682_s13), 1 }
   0xe   : > { %s711_s18 = sshll.u32 %s1033_s13, 5 }
   0xf   : > { %s165_s23 = scalar_lea.vmem %s1028_s0, %s711_s18  ;;  %s170_s27 = scalar_lea.vmem %s1031_s3, %s711_s18 }
  0x10   : > { %v894_v6 = vld [vmem:[%s165_s23] sm:$0xff]  ;;  %v896_v7 = vld [vmem:[%s165_s23 + $0x8] sm:$0xff]  ;;  %v898_v8 = vld [vmem:[%s165_s23 + $0x10] sm:$0xff]  ;;  %214 = vperm.xlu1 %786, %v182_v11  }
  0x11   : > { %v762_v9 = vpack.c.bf16 %v896_v7, %v894_v6  ;;  %v902_v10 = vld [vmem:[%s165_s23 + $0x18] sm:$0xff] }
  0x12   : > { %v765_v12 = vpack.c.bf16 %v902_v10, %v898_v8 }
  0x13   : > { %763 = vmatpush3.bf16.msra.mxu0 %v762_v9  ;;  %769 = vmatpush3.bf16.msra.mxu1 %v762_v9 }
  0x14   : > { %764 = vmatprep.subr.bf16.mxu0 %v843_v0  ;;  %768 = vmatprep.subr.bf16.mxu1 %v843_v0 }
  0x17   : > { %766 = vmatpush3.bf16.msra.mxu0 %v765_v12  ;;  %770 = vmatpush3.bf16.msra.mxu1 %v765_v12 }
  0x1a   : > { %735 = vmatmul.mubr.msk.f32.vlgmr.msra.gmra.mrb[0].mxu0 %vm247_vm1, %v171_v13  ;;  %750 = vmatmul.mubr.msk.f32.vlgmr.msra.gmra.mrb[0].mxu1 %vm247_vm1, %v176_v14  ;;  %v185_v14 = vld [vmem:[%s1030_s2 + $0x28] sm:$0xff] }
  0x1b   : > { %737 = vmatprep.mubr.msk.f32.mxu0 %vm844_vm0, %v845_v1  ;;  %752 = vmatprep.mubr.msk.f32.mxu1 %vm844_vm0, %v845_v1 }
  0x1e   : > { %738 = vmatmul.mubr.msk.f32.gmra.mrb[2].mxu0 %vm247_vm1, %v172_v15  ;;  %753 = vmatmul.mubr.msk.f32.gmra.mrb[2].mxu1 %vm247_vm1, %v177_v16  ;;  %v186_v15 = vld [vmem:[%s1030_s2 + $0x30] sm:$0xff]  ;;  %v197_v16 = vld [vmem:[%s1030_s2 + $0x88] sm:$0xff] }
  0x1f   : > { %740 = vmatprep.mubr.msk.f32.mxu0 %vm844_vm0, %v845_v1  ;;  %755 = vmatprep.mubr.msk.f32.mxu1 %vm844_vm0, %v845_v1  ;;  %771 = vpush %v197_v16 }
  0x22   : > { %741 = vmatmul.mubr.msk.f32.gmra.mrb[4].mxu0 %vm247_vm1, %v173_v17  ;;  %756 = vmatmul.mubr.msk.f32.gmra.mrb[4].mxu1 %vm247_vm1, %v178_v18 }
  0x23   : > { %743 = vmatprep.mubr.msk.f32.mxu0 %vm844_vm0, %v845_v1  ;;  %758 = vmatprep.mubr.msk.f32.mxu1 %vm844_vm0, %v845_v1 }
  0x26   : > { %744 = vmatmul.mubr.msk.f32.gmra.mrb[6].mxu0 %vm247_vm1, %v174_v19  ;;  %759 = vmatmul.mubr.msk.f32.gmra.mrb[6].mxu1 %vm247_vm1, %v179_v20 }
  0x27   : > { %746 = vmatprep.mubr.msk.f32.mxu0 %vm844_vm0, %v845_v1 }
  0x2a   : > { %747 = vmatmul.mubr.msk.f32.gmra.mrb[8].mxu0 %vm247_vm1, %v175_v21 }
  0x50   : > { %s772_s24 = spop %771 }
  0x87   : > { %v205_v51 = vpop.permute.xlu1 %204 }
  0x88   : > { %v225_v30 = vpop.permute.xlu0 %224 }
  0x8b   : > { %v210_v52 = vpop.permute.xlu1 %209 }
  0x8f   : > { %v215_v53 = vpop.permute.xlu1 %214 }
  0xed   : > { %v341_v22 = vpop.f32.mrb[0].mxu0  ;;  %v953_v35 = vpop.f32.mrb[0].mxu1 }
  0xee   : > { %v736_v23 = vpop.f32.mrb[1].mxu0  ;;  %v751_v36 = vpop.f32.mrb[1].mxu1  ;;  %v342_v60 = vadd.f32 %v341_v22, %v205_v51 }
  0xf1   : > { %v346_v24 = vpop.f32.mrb[2].mxu0  ;;  %v955_v37 = vpop.f32.mrb[2].mxu1 }
  0xf2   : > { %v739_v25 = vpop.f32.mrb[3].mxu0  ;;  %v754_v38 = vpop.f32.mrb[3].mxu1  ;;  %v347_v61 = vadd.f32 %v346_v24, %v210_v52 }
  0xf5   : > { %v351_v26 = vpop.f32.mrb[4].mxu0  ;;  %v376_v40 = vpop.f32.mrb[4].mxu1 }
  0xf6   : > { %v742_v27 = vpop.f32.mrb[5].mxu0  ;;  %v757_v41 = vpop.f32.mrb[5].mxu1  ;;  %v352_v1 = vadd.f32 %v351_v26, %v215_v53 }
  0xf9   : > { %v356_v28 = vpop.f32.mrb[6].mxu0  ;;  %v381_v42 = vpop.f32.mrb[6].mxu1 }
  0xfa   : > { %v745_v29 = vpop.f32.mrb[7].mxu0  ;;  %v760_v43 = vpop.f32.mrb[7].mxu1 }
  0xfd   : > { %v361_v31 = vpop.f32.mrb[8].mxu0 }
  0xfe   : > { %v362_v32 = vadd.f32 %v361_v31, %v225_v30  ;;  %v748_v33 = vpop.f32.mrb[9].mxu0 }
 0x100   : > { %v386_v34 = vsel %vm385_vm2, %v362_v32, -inf }
 0x101   : > { %387 = vmax.xlane.f32.xlu0 %v386_v34 }
 0x117   : > { %244 = vperm.xlu0 %785, %v188_v39  }
 0x18e   : > { %v388_v44 = vpop.xlane.xlu0 %387 }
 0x18f   : > { %v389_v45 = vsub.f32 %v362_v32, %v388_v44 }
 0x191   : > { %v390_v46 = vmul.f32 1.442695, %v389_v45 }
 0x193   : > { %787 = vpow2.f32 %v390_v46 }
 0x196   : > { %v245_v12 = vpop.permute.xlu0 %244 }
 0x197   : > { %v382_v13 = vadd.f32 %v381_v42, %v245_v12 }
 0x19d   : > { %v788_v47 = vpop.eup %787 }
 0x19e   : > { %v392_v48 = vsel %vm385_vm2, %v788_v47, 0.0 }
 0x19f   : > { %393 = vadd.xlane.f32.xlu1 %v392_v48 }
 0x1b0   : > { %219 = vperm.xlu1 %786, %v183_v49  }
 0x1b4   : > { %239 = vperm.xlu1 %786, %v187_v50  }
 0x22c   : > { %v394_v54 = vpop.xlane.xlu1 %393 }
 0x22d   : > { %789 = vrcp.f32 %v394_v54 }
 0x230   : > { %v220_v2 = vpop.permute.xlu1 %219 }
 0x231   : > { %v357_v4 = vadd.f32 %v356_v28, %v220_v2 }
 0x234   : > { %v240_v9 = vpop.permute.xlu1 %239 }
 0x235   : > { %v377_v11 = vadd.f32 %v376_v40, %v240_v9 }
 0x237   : > { %v790_v58 = vpop.eup %789 }
 0x238   : > { %v396_v59 = vmul.f32 %v790_v58, %v788_v47 }
 0x23a   : > { %v400_v62 = vrot.slane %v396_v59, %v399_v57 }
 0x23c   : > { %v402_v63 = vmul.f32 %v400_v62, %v347_v61  ;;  %v401_v0 = vmul.f32 %v400_v62, %v342_v60  ;;  %v403_v3 = vmul.f32 %v400_v62, %v352_v1  ;;  %v404_v5 = vmul.f32 %v400_v62, %v357_v4 }
 0x23e   : > { %407 = vadd.xlane.f32.xlu0 %v402_v63  ;;  %405 = vadd.xlane.f32.xlu1 %v401_v0 }
 0x242   : > { %409 = vadd.xlane.f32.xlu1 %v403_v3 }
 0x246   : > { %411 = vadd.xlane.f32.xlu1 %v404_v5 }
 0x24a   : > { %479 = vadd.xlane.f32.xlu1 %v377_v11 }
 0x24e   : > { %481 = vadd.xlane.f32.xlu1 %v382_v13 }
 0x254   : > { %229 = vperm.xlu0 %785, %v185_v14   ;;  %v189_v14 = vld [vmem:[%s1030_s2 + $0x48] sm:$0xff] }
 0x25f   : > { %234 = vperm.xlu1 %786, %v186_v15  }
 0x2cb   : > { %v406_v17 = vpop.xlane.xlu1 %405  ;;  %v408_v18 = vpop.xlane.xlu0 %407 }
 0x2cc   : > { %v413_v20 = vadd.f32 %v408_v18, %v406_v17 }
 0x2cf   : > { %v410_v19 = vpop.xlane.xlu1 %409 }
 0x2d0   : > { %v414_v21 = vadd.f32 %v413_v20, %v410_v19  ;;  %v193_v20 = vld [vmem:[%s1030_s2 + $0x68] sm:$0xff] }
 0x2d3   : > { %v412_v22 = vpop.xlane.xlu1 %411 }
 0x2d4   : > { %v415_v23 = vadd.f32 %v414_v21, %v412_v22 }
 0x2d6   : > { %v416_v24 = vrot.slane %v415_v23, 4 }
 0x2d7   : > { %v480_v25 = vpop.xlane.xlu1 %479 }
 0x2d8   : > { %v417_v26 = vadd.f32 %v416_v24, %v415_v23  ;;  %v483_v30 = vmul.f32 0.0078125, %v480_v25  ;;  %v194_v25 = vld [vmem:[%s1030_s2 + $0x70] sm:$0xff] }
 0x2da   : > { %v418_v27 = vrot.slane %v417_v26, 2 }
 0x2db   : > { %v482_v28 = vpop.xlane.xlu1 %481 }
 0x2dc   : > { %v419_v29 = vadd.f32 %v418_v27, %v417_v26  ;;  %v484_v31 = vmul.f32 0.0078125, %v482_v28  ;;  %v195_v26 = vld [vmem:[%s1030_s2 + $0x78] sm:$0xff]  ;;  %v196_v27 = vld [vmem:[%s1030_s2 + $0x80] sm:$0xff] }
 0x2de   : > { %v420_v32 = vrot.slane %v419_v29, 1  ;;  %v485_v33 = vmax.f32 %v483_v30, %v484_v31 }
 0x2e0   : > { %v421_v34 = vadd.f32 %v420_v32, %v419_v29  ;;  %v486_v36 = vrot.slane %v485_v33, 4 }
 0x2e2   : > { %v422_v38 = vmul.f32 0.03125, %v421_v34  ;;  %v487_v39 = vmax.f32 %v485_v33, %v486_v36 }
 0x2e4   : > { %v423_v40 = vsub.f32 %v406_v17, %v422_v38  ;;  %v424_v41 = vsub.f32 %v408_v18, %v422_v38  ;;  %v425_v42 = vsub.f32 %v410_v19, %v422_v38  ;;  %v488_v43 = vrot.slane %v487_v39, 2  ;;  %v190_v17 = vld [vmem:[%s1030_s2 + $0x50] sm:$0xff]  ;;  %v191_v18 = vld [vmem:[%s1030_s2 + $0x58] sm:$0xff]  ;;  %v192_v19 = vld [vmem:[%s1030_s2 + $0x60] sm:$0xff] }
 0x2e5   : > { %v426_v44 = vsub.f32 %v412_v22, %v422_v38 }
 0x2e6   : > { %v427_v45 = vmul.f32 %v423_v40, %v423_v40  ;;  %v428_v46 = vmul.f32 %v424_v41, %v424_v41  ;;  %v489_v47 = vmax.f32 %v487_v39, %v488_v43  ;;  %v429_v48 = vmul.f32 %v425_v42, %v425_v42  ;;  %v230_v43 = vpop.permute.xlu0 %229 }
 0x2e7   : > { %v430_v51 = vmul.f32 %v426_v44, %v426_v44 }
 0x2e8   : > { %v431_v49 = vadd.f32 %v428_v46, %v427_v45  ;;  %v490_v50 = vrot.slane %v489_v47, 1  ;;  %v367_v46 = vadd.f32 %v953_v35, %v230_v43 }
 0x2ea   : > { %v432_v52 = vadd.f32 %v431_v49, %v429_v48  ;;  %v491_v53 = vmax.f32 %v489_v47, %v490_v50 }
 0x2ec   : > { %v433_v54 = vadd.f32 %v432_v52, %v430_v51  ;;  %v492_v55 = vsub.f32 %v483_v30, %v491_v53  ;;  %v493_v56 = vsub.f32 %v484_v31, %v491_v53 }
 0x2ee   : > { %v434_v57 = vrot.slane %v433_v54, 4  ;;  %v494_v58 = vmul.f32 1.442695, %v492_v55  ;;  %v496_v59 = vmul.f32 1.442695, %v493_v56 }
 0x2f0   : > { %v435_v60 = vadd.f32 %v434_v57, %v433_v54  ;;  %791 = vpow2.f32 %v494_v58 }
 0x2f1   : > { %793 = vpow2.f32 %v496_v59 }
 0x2f2   : > { %v436_v61 = vrot.slane %v435_v60, 2 }
 0x2f4   : > { %v437_v62 = vadd.f32 %v436_v61, %v435_v60 }
 0x2f6   : > { %v438_v63 = vrot.slane %v437_v62, 1 }
 0x2f8   : > { %v439_v0 = vadd.f32 %v438_v63, %v437_v62 }
 0x2fa   : > { %v440_v1 = vmul.f32 0.03125, %v439_v0  ;;  %v792_v2 = vpop.eup %791 }
 0x2fb   : > { %v794_v3 = vpop.eup %793 }
 0x2fc   : > { %v441_v4 = vadd.f32 1e-05, %v440_v1  ;;  %v498_v5 = vadd.f32 %v794_v3, %v792_v2 }
 0x2fe   : > { %795 = vrsqrt.f32 %v441_v4  ;;  %v499_v9 = vrot.slane %v498_v5, 4 }
 0x300   : > { %v500_v11 = vadd.f32 %v499_v9, %v498_v5 }
 0x302   : > { %v501_v12 = vrot.slane %v500_v11, 2 }
 0x304   : > { %v502_v13 = vadd.f32 %v501_v12, %v500_v11 }
 0x306   : > { %v503_v15 = vrot.slane %v502_v13, 1 }
 0x308   : > { %v796_v16 = vpop.eup %795  ;;  %v504_v28 = vadd.f32 %v503_v15, %v502_v13  ;;  %v565_v15 = vstv %s772_s24 }
 0x309   : > { %v443_v21 = vmul.f32 %v796_v16, %v423_v40  ;;  %v444_v22 = vmul.f32 %v796_v16, %v424_v41  ;;  %v445_v23 = vmul.f32 %v796_v16, %v425_v42  ;;  %v446_v24 = vmul.f32 %v796_v16, %v426_v44  ;;  %v235_v44 = vpop.permute.xlu1 %234 }
 0x30a   : > { %797 = vrcp.f32 %v504_v28  ;;  %v372_v49 = vadd.f32 %v955_v37, %v235_v44 }
 0x30b   : > { %v447_v29 = vmul.f32 %v443_v21, %v189_v14  ;;  %v448_v30 = vmul.f32 %v444_v22, %v190_v17  ;;  %v449_v31 = vmul.f32 %v445_v23, %v191_v18  ;;  %v450_v32 = vmul.f32 %v446_v24, %v192_v19 }
 0x30d   : > { %v451_v33 = vadd.f32 %v447_v29, %v193_v20  ;;  %v452_v34 = vadd.f32 %v448_v30, %v194_v25  ;;  %v453_v36 = vadd.f32 %v449_v31, %v195_v26  ;;  %v454_v38 = vadd.f32 %v450_v32, %v196_v27 }
 0x30f   : > { %v700_v39 = vmul.f32 -1.442695, %v451_v33  ;;  %v701_v40 = vmul.f32 -1.442695, %v452_v34  ;;  %v702_v41 = vmul.f32 -1.442695, %v453_v36 }
 0x310   : > { %v703_v42 = vmul.f32 -1.442695, %v454_v38 }
 0x311   : > { %799 = vpow2.f32 %v700_v39 }
 0x312   : > { %801 = vpow2.f32 %v701_v40 }
 0x313   : > { %803 = vpow2.f32 %v702_v41 }
 0x314   : > { %805 = vpow2.f32 %v703_v42  ;;  %v798_v45 = vpop.eup %797 }
 0x315   : > { %v506_v47 = vmul.f32 %v798_v45, %v792_v2  ;;  %v507_v48 = vmul.f32 %v798_v45, %v794_v3 }
 0x317   : > { %v508_v50 = vmul.f32 %v506_v47, %v367_v46  ;;  %v509_v51 = vmul.f32 %v507_v48, %v372_v49 }
 0x319   : > { %v510_v53 = vadd.f32 %v509_v51, %v508_v50 }
 0x31b   : > { %v800_v52 = vpop.eup %799  ;;  %v511_v63 = vrot.slane %v510_v53, 4 }
 0x31c   : > { %v802_v54 = vpop.eup %801  ;;  %v467_v55 = vadd.f32 1.0, %v800_v52 }
 0x31d   : > { %v804_v56 = vpop.eup %803  ;;  %v468_v57 = vadd.f32 1.0, %v802_v54  ;;  %v512_v0 = vadd.f32 %v511_v63, %v510_v53 }
 0x31e   : > { %v806_v58 = vpop.eup %805  ;;  %v469_v59 = vadd.f32 1.0, %v804_v56  ;;  %807 = vrcp.f32 %v467_v55 }
 0x31f   : > { %v470_v60 = vadd.f32 1.0, %v806_v58  ;;  %809 = vrcp.f32 %v468_v57  ;;  %v513_v1 = vrot.slane %v512_v0, 2 }
 0x320   : > { %811 = vrcp.f32 %v469_v59 }
 0x321   : > { %813 = vrcp.f32 %v470_v60  ;;  %v514_v2 = vadd.f32 %v513_v1, %v512_v0 }
 0x323   : > { %v515_v3 = vrot.slane %v514_v2, 1 }
 0x325   : > { %v516_v4 = vadd.f32 %v515_v3, %v514_v2 }
 0x327   : > { %v704_v5 = vmul.f32 -1.442695, %v516_v4 }
 0x328   : > { %v808_v35 = vpop.eup %807 }
 0x329   : > { %v810_v61 = vpop.eup %809  ;;  %525 = vperm.xlu1 %786, %v808_v35   ;;  %815 = vpow2.f32 %v704_v5 }
 0x32a   : > { %530 = vperm.xlu0 %785, %v810_v61   ;;  %v812_v37 = vpop.eup %811 }
 0x32b   : > { %v814_v62 = vpop.eup %813 }
 0x32d   : > { %535 = vperm.xlu1 %786, %v812_v37  }
 0x32e   : > { %540 = vperm.xlu0 %785, %v814_v62  }
 0x333   : > { %v816_v9 = vpop.eup %815 }
 0x334   : > { %v520_v11 = vadd.f32 1.0, %v816_v9 }
 0x336   : > { %817 = vrcp.f32 %v520_v11 }
 0x340   : > { %v818_v12 = vpop.eup %817 }
 0x341   : > { %v547_v13 = vmul.f32 %v818_v12, %v894_v6  ;;  %v548_v14 = vmul.f32 %v818_v12, %v896_v7  ;;  %v549_v16 = vmul.f32 %v818_v12, %v898_v8  ;;  %v550_v17 = vmul.f32 %v818_v12, %v902_v10 }
 0x343   : > { %v579_v19 = vmul.f32 %v565_v15, %v547_v13  ;;  %v580_v20 = vmul.f32 %v565_v15, %v548_v14  ;;  %vm575_vm3 = vcmp.ge.f32.partialorder %v547_v13, 0.0  ;;  %vm576_vm4 = vcmp.ge.f32.partialorder %v548_v14, 0.0 }
 0x344   : > { %vm577_vm5 = vcmp.ge.f32.partialorder %v549_v16, 0.0  ;;  %v581_v26 = vmul.f32 %v565_v15, %v549_v16  ;;  %vm578_vm7 = vcmp.ge.f32.partialorder %v550_v17, 0.0  ;;  %v582_v28 = vmul.f32 %v565_v15, %v550_v17 }
 0x345   : > { %v583_v29 = vsel %vm575_vm3, %v547_v13, %v579_v19  ;;  %v584_v30 = vsel %vm576_vm4, %v548_v14, %v580_v20 }
 0x346   : > { %v585_v51 = vsel %vm577_vm5, %v549_v16, %v581_v26  ;;  %v586_v52 = vsel %vm578_vm7, %v550_v17, %v582_v28 }
 0x3a8   : > { %v526_v18 = vpop.permute.xlu1 %525 }
 0x3a9   : > { %v543_v21 = vmul.f32 %v526_v18, %v894_v6  ;;  %v551_v22 = vadd.f32 %v818_v12, %v526_v18  ;;  %v531_v23 = vpop.permute.xlu0 %530 }
 0x3aa   : > { %v544_v24 = vmul.f32 %v531_v23, %v896_v7  ;;  %v552_v25 = vadd.f32 %v818_v12, %v531_v23 }
 0x3ab   : > { %vm559_vm6 = vcmp.ge.f32.partialorder %v543_v21, 0.0  ;;  %v567_v27 = vmul.f32 %v565_v15, %v543_v21  ;;  %v555_v33 = vmul.f32 %v551_v22, %v894_v6 }
 0x3ac   : > { %vm560_vm8 = vcmp.ge.f32.partialorder %v544_v24, 0.0  ;;  %v568_v31 = vmul.f32 %v565_v15, %v544_v24  ;;  %v536_v32 = vpop.permute.xlu1 %535  ;;  %v556_v36 = vmul.f32 %v552_v25, %v896_v7 }
 0x3ad   : > { %v571_v34 = vsel %vm559_vm6, %v543_v21, %v567_v27  ;;  %v545_v38 = vmul.f32 %v536_v32, %v898_v8  ;;  %v541_v39 = vpop.permute.xlu0 %540  ;;  %v553_v42 = vadd.f32 %v818_v12, %v536_v32 }
 0x3ae   : > { %v587_v40 = vadd.f32 %v583_v29, %v571_v34  ;;  %v572_v41 = vsel %vm560_vm8, %v544_v24, %v568_v31  ;;  %v546_v43 = vmul.f32 %v541_v39, %v902_v10  ;;  %v554_v46 = vadd.f32 %v818_v12, %v541_v39 }
 0x3af   : > { %v588_v44 = vadd.f32 %v584_v30, %v572_v41  ;;  %vm561_vm9 = vcmp.ge.f32.partialorder %v545_v38, 0.0  ;;  %v569_v45 = vmul.f32 %v565_v15, %v545_v38  ;;  %v557_v54 = vmul.f32 %v553_v42, %v898_v8 }
 0x3b0   : > { %v591_v47 = vmul.f32 %v587_v40, %v555_v33  ;;  %vm562_vm10 = vcmp.ge.f32.partialorder %v546_v43, 0.0  ;;  %v570_v48 = vmul.f32 %v565_v15, %v546_v43  ;;  %v558_v58 = vmul.f32 %v554_v46, %v902_v10 }
 0x3b1   : > { %v592_v49 = vmul.f32 %v588_v44, %v556_v36  ;;  %v573_v50 = vsel %vm561_vm9, %v545_v38, %v569_v45 }
 0x3b2   : > { %v705_v53 = vmul.f32 -1.442695, %v591_v47  ;;  %v589_v55 = vadd.f32 %v585_v51, %v573_v50  ;;  %v574_v56 = vsel %vm562_vm10, %v546_v43, %v570_v48 }
 0x3b3   : > { %v706_v57 = vmul.f32 -1.442695, %v592_v49  ;;  %v590_v59 = vadd.f32 %v586_v52, %v574_v56 }
 0x3b4   : > { %819 = vpow2.f32 %v705_v53  ;;  %v593_v60 = vmul.f32 %v589_v55, %v557_v54 }
 0x3b5   : > { %821 = vpow2.f32 %v706_v57  ;;  %v594_v35 = vmul.f32 %v590_v59, %v558_v58 }
 0x3b6   : > { %v707_v61 = vmul.f32 -1.442695, %v593_v60 }
 0x3b7   : > { %v708_v37 = vmul.f32 -1.442695, %v594_v35 }
 0x3b8   : > { %823 = vpow2.f32 %v707_v61 }
 0x3b9   : > { %825 = vpow2.f32 %v708_v37 }
 0x3be   : > { %v820_v62 = vpop.eup %819 }
 0x3bf   : > { %v822_v63 = vpop.eup %821  ;;  %v607_v0 = vadd.f32 1.0, %v820_v62 }
 0x3c0   : > { %v608_v1 = vadd.f32 1.0, %v822_v63 }
 0x3c1   : > { %827 = vrcp.f32 %v607_v0 }
 0x3c2   : > { %v824_v2 = vpop.eup %823  ;;  %829 = vrcp.f32 %v608_v1 }
 0x3c3   : > { %v826_v3 = vpop.eup %825  ;;  %v609_v4 = vadd.f32 1.0, %v824_v2 }
 0x3c4   : > { %v610_v5 = vadd.f32 1.0, %v826_v3 }
 0x3c5   : > { %831 = vrcp.f32 %v609_v4 }
 0x3c6   : > { %833 = vrcp.f32 %v610_v5 }
 0x3cb   : > { %v828_v9 = vpop.eup %827 }
 0x3cc   : > { %v830_v11 = vpop.eup %829  ;;  %v619_v12 = vmul.f32 %v828_v9, %v894_v6 }
 0x3cd   : > { %v620_v13 = vmul.f32 %v830_v11, %v896_v7 }
 0x3ce   : > { %623 = vst [vmem:[%s170_s27] sm:$0xff] %v619_v12 }
 0x3cf   : > { %v832_v14 = vpop.eup %831  ;;  %624 = vst [vmem:[%s170_s27 + $0x8] sm:$0xff] %v620_v13 }
 0x3d0   : > { %v834_v15 = vpop.eup %833  ;;  %v621_v16 = vmul.f32 %v832_v14, %v898_v8 }
 0x3d1   : > { %v622_v17 = vmul.f32 %v834_v15, %v902_v10 }
 0x3d2   : > { %625 = vst [vmem:[%s170_s27 + $0x10] sm:$0xff] %v621_v16 }
 0x3d3   : > { %626 = vst [vmem:[%s170_s27 + $0x18] sm:$0xff] %v622_v17 }
 0x3d4 PF: > { %s13_s12 = sadd.s32 1, %s841_s12  }
 0x3d5   : > { %p10_p4 = scmp.ge.s32.totalorder %s13_s12, 4  }
 0x3d7   :  { %12 = sbr.rel (!%p10_p4) target bundleno = 1 (0x1), region = 62 }

</bundles_post_ra>
